<compile_context>
chip_gen: v7x
topology: tpu7x:2x2x1
jax: 0.10.0
libtpu: 0.0.40
codegen_flags: <defaults>
</compile_context>

<pallas_src>
from functools import partial

import jax
import jax.numpy as jnp
import numpy as np
from jax.experimental import pallas as pl
from jax.experimental.pallas import tpu as pltpu

_LANE = 128


def _round_up(x, m):
    return ((x + m - 1) // m) * m


def _vmem_capacity_bytes(default=64 * 2**20):
    """Best-effort VMEM capacity query (falls back to the v7x 64 MiB floor)."""
    try:
        info = pltpu.get_tpu_info()
        return int(getattr(info, "vmem_capacity_bytes", default))
    except Exception:
        return default


def _pick_row_tile(Ho, Wo, max_rows=256, min_rows=128):
    """Largest divisor of Ho with tHo*Wo <= max_rows; prefer >=2 row tiles
    (pipelining + megacore sharding) if the split keeps the matmul M >= min_rows."""
    best = 1
    for t in range(1, Ho + 1):
        if Ho % t == 0 and t * Wo <= max_rows:
            best = t
    if best == Ho and Ho > 1:
        for t in range(Ho - 1, 0, -1):
            if Ho % t == 0 and t * Wo <= max_rows and t * Wo >= min_rows:
                best = t
                break
    return best


def _conv2d_kernel(x_ref, w_ref, o_ref, patch_ref, *,
                   KH, KW, tHo, Wo, sh, sw, Ct, Cout):
    """One grid step = one (batch element, output-row tile).

    x_ref     : (1, Hp, Wpx, Ct)      padded image, resident across the row axis
    w_ref     : (KH*KW*Ct, Cp_out)    packed im2col weight, whole-array in VMEM
    o_ref     : (1, tHo, Wo, Cout)    unpadded output row tile
    patch_ref : (tHo*Wo, KH*KW*Ct)    VMEM scratch for the packed im2col patch
    """
    r = pl.program_id(1)
    row0 = pl.multiple_of(r * (tHo * sh), tHo * sh)  # first padded-input row of tile

    M = tHo * Wo
    tap = 0
    # Static KH*KW loop: each tap writes one Ct-wide column block of the packed
    # patch (dense K — no 128-wide zero padding per tap).  Every column of the
    # scratch is overwritten each step, so no explicit zeroing is needed.
    for i in range(KH):
        hs = pl.ds(row0 + i, tHo) if sh == 1 else pl.ds(row0 + i, tHo, sh)
        for j in range(KW):
            ws = pl.ds(j, Wo) if sw == 1 else pl.ds(j, Wo, sw)
            win = x_ref[0, hs, ws, :]                        # (tHo, Wo, Ct)
            patch_ref[:, tap * Ct:(tap + 1) * Ct] = win.reshape(M, Ct)
            tap += 1

    # Single fused contraction on the MXU (K = KH*KW*Ct), f32 accumulation.
    acc = jnp.dot(patch_ref[...], w_ref[...], preferred_element_type=jnp.float32)
    # Slice the lane-dense matmul result down to the real Cout before storing.
    o_ref[0] = acc[:, :Cout].reshape(tHo, Wo, Cout).astype(o_ref.dtype)


def conv2d_pallas(x_nchw, w_oihw, stride=1, padding=0, compute_dtype=None):
    """Equivalent of torch.nn.Conv2d(..., bias=False) forward (NCHW in/out).

    compute_dtype=None keeps nn.Conv2d (f32) numerics; pass jnp.bfloat16 for
    MXU-native bf16 compute with f32 accumulation (looser tolerance).
    """
    N, Cin, H, W = x_nchw.shape
    Cout, Cin_w, KH, KW = w_oihw.shape
    assert Cin == Cin_w
    sh = sw = int(stride)
    p = int(padding)

    Ho = (H + 2 * p - KH) // sh + 1
    Wo = (W + 2 * p - KW) // sw + 1
    Hp = H + 2 * p

    out_dtype = x_nchw.dtype
    if compute_dtype is None:
        compute_dtype = x_nchw.dtype
    c_itemsize = np.dtype(compute_dtype).itemsize
    sub = 8 if c_itemsize >= 4 else (16 if c_itemsize == 2 else 32)

    # Packed-K layout: per-tap channel width padded only to the sublane
    # multiple; fused contraction dim K = KH*KW*Ct.  Matmul N padded to 128
    # lanes (free on the MXU); the output itself is written unpadded.
    Ct = _round_up(Cin, sub)
    K = KH * KW * Ct
    Cp_out = _round_up(Cout, _LANE)

    # Pad Wo to a sublane multiple so the in-kernel reshape stays tile-aligned;
    # pad the input width so the extra output columns read zeros.
    Wo_p = _round_up(Wo, 8)
    Wp_x = max(W + 2 * p, (Wo_p - 1) * sw + KW)

    # NCHW -> NHWC, spatial + channel pad in one jnp.pad (boundary glue).
    x_nhwc = jnp.transpose(x_nchw, (0, 2, 3, 1)).astype(compute_dtype)
    x_pad = jnp.pad(x_nhwc, ((0, 0), (p, p), (p, Wp_x - W - p), (0, Ct - Cin)))

    # OIHW -> HWIO -> (KH*KW*Ct, Cp_out) packed im2col weight matrix.
    w_hwio = jnp.transpose(w_oihw, (2, 3, 1, 0)).astype(compute_dtype)
    w_padc = jnp.pad(w_hwio, ((0, 0), (0, 0), (0, Ct - Cin), (0, Cp_out - Cout)))
    w_mat = w_padc.reshape(K, Cp_out)

    # Generation-dependent row-tile cap: bigger tiles on 128-MiB VMEM chips.
    vmem_cap = _vmem_capacity_bytes()
    max_rows = 512 if vmem_cap >= 100 * 2**20 else 256
    tHo = _pick_row_tile(Ho, Wo_p, max_rows=max_rows)
    n_rt = Ho // tHo
    M = tHo * Wo_p

    # Explicit VMEM budget: 2x (pipelined) image + output blocks, resident
    # weight, patch scratch, plus generous margin.
    need = (2 * Hp * Wp_x * Ct * c_itemsize
            + 2 * tHo * Wo_p * Cout * np.dtype(out_dtype).itemsize
            + K * Cp_out * c_itemsize
            + M * K * c_itemsize)
    vmem_limit = int(min(128 * 2**20, max(4 * need, 32 * 2**20)))

    flops = 2 * N * Ho * Wo * KH * KW * Cin * Cout
    bytes_accessed = (x_nchw.size * x_nchw.dtype.itemsize
                      + w_oihw.size * w_oihw.dtype.itemsize
                      + N * Ho * Wo * Cout * np.dtype(out_dtype).itemsize)

    kernel = partial(
        _conv2d_kernel,
        KH=KH, KW=KW, tHo=tHo, Wo=Wo_p, sh=sh, sw=sw, Ct=Ct, Cout=Cout,
    )

    out_nhwc = pl.pallas_call(
        kernel,
        out_shape=jax.ShapeDtypeStruct((N, Ho, Wo_p, Cout), out_dtype),
        grid=(N, n_rt),
        in_specs=[
            # Whole padded image per batch element; block index constant across
            # the inner row axis -> fetched once per n, revisited per row tile.
            pl.BlockSpec((1, Hp, Wp_x, Ct), lambda n, r: (n, 0, 0, 0)),
            # Packed im2col weight: whole array resident in VMEM, single copy,
            # no per-step DMA and no second pipeline buffer.
            pl.BlockSpec(memory_space=pltpu.MemorySpace.VMEM),
        ],
        out_specs=pl.BlockSpec((1, tHo, Wo_p, Cout), lambda n, r: (n, r, 0, 0)),
        scratch_shapes=[
            pltpu.VMEM((M, K), compute_dtype),   # packed im2col patch
        ],
        compiler_params=pltpu.CompilerParams(
            # Both axes independent -> shard across v7x's 2 TensorCores.
            dimension_semantics=("parallel", "parallel"),
            vmem_limit_bytes=vmem_limit,
        ),
        cost_estimate=pl.CostEstimate(
            flops=flops, transcendentals=0, bytes_accessed=bytes_accessed),
    )(x_pad, w_mat)

    # Drop any Wo padding, NHWC -> NCHW to match the PyTorch output convention.
    out = out_nhwc[:, :, :Wo, :] if Wo_p != Wo else out_nhwc
    return jnp.transpose(out, (0, 3, 1, 2))


if __name__ == "__main__":
    # TorchConv2D(in=4, out=8, kernel=3, stride=1, padding=1) on x (2,4,16,16) NCHW.
    N, Cin, H, W = 2, 4, 16, 16
    Cout, Ksz, stride, padding = 8, 3, 1, 1

    key = jax.random.PRNGKey(0)
    kx, kw = jax.random.split(key)
    x = jax.random.normal(kx, (N, Cin, H, W), dtype=jnp.float32)
    w = jax.random.normal(kw, (Cout, Cin, Ksz, Ksz), dtype=jnp.float32) * 0.1

    # f32 path (matches nn.Conv2d bias=False numerics), checked against XLA conv.
    out = conv2d_pallas(x, w, stride=stride, padding=padding)
    out = jax.block_until_ready(out)

    ref = jax.lax.conv_general_dilated(
        x, w,
        window_strides=(stride, stride),
        padding=((padding, padding), (padding, padding)),
        dimension_numbers=("NCHW", "OIHW", "NCHW"),
    )
    np.testing.assert_allclose(np.asarray(out), np.asarray(ref), atol=1e-4, rtol=1e-4)

    # bf16 compute path (MXU-native, f32 accumulation); loose tolerance vs f32 ref.
    # Note: this quantizes the inputs to bf16, unlike torch autocast semantics.
    out_bf16 = conv2d_pallas(x, w, stride=stride, padding=padding,
                             compute_dtype=jnp.bfloat16)
    out_bf16 = jax.block_until_ready(out_bf16)
    np.testing.assert_allclose(np.asarray(out_bf16), np.asarray(ref),
                               atol=5e-2, rtol=5e-2)

    print("KERNEL_OK")
</pallas_src>

<mosaic_0001>
module attributes {stable_mosaic.version = 11 : i64} {
  func.func @_conv2d_kernel(%arg0: i32, %arg1: i32, %arg2: memref<1x18x18x8xf32, #tpu.memory_space<vmem>>, %arg3: memref<72x128xf32, #tpu.memory_space<vmem>>, %arg4: memref<1x8x16x8xf32, #tpu.memory_space<vmem>>, %arg5: memref<128x72xf32, #tpu.memory_space<vmem>>) attributes {dimension_semantics = [#tpu.dimension_semantics<parallel>, #tpu.dimension_semantics<parallel>], iteration_bounds = array<i64: 2, 2>, scalar_prefetch = 0 : i64, scratch_operands = 1 : i64, tpu.core_type = #tpu.core_type<tc>, window_params = [{transform_indices = @transform_0, window_bounds = array<i64: 1, 18, 18, 8>}, {pipeline_mode = #tpu.pipeline_mode<synchronous>, transform_indices = @transform_1, window_bounds = array<i64: 72, 128>}, {transform_indices = @transform_2, window_bounds = array<i64: 1, 8, 16, 8>}]} {
    %c8_i32 = arith.constant 8 : i32
    %0 = arith.muli %arg1, %c8_i32 : i32
    %1 = tpu.assume_multiple %0, 8 : i32
    %c0_i32 = arith.constant 0 : i32
    %2 = arith.addi %1, %c0_i32 : i32
    %c0 = arith.constant 0 : index
    %3 = arith.index_cast %2 : i32 to index
    %c0_0 = arith.constant 0 : index
    %c0_1 = arith.constant 0 : index
    %4 = vector.load %arg2[%c0, %3, %c0_0, %c0_1] : memref<1x18x18x8xf32, #tpu.memory_space<vmem>>, vector<1x8x16x8xf32>
    %5 = vector.shape_cast %4 : vector<1x8x16x8xf32> to vector<8x16x8xf32>
    %6 = vector.shape_cast %5 : vector<8x16x8xf32> to vector<128x8xf32>
    %c0_2 = arith.constant 0 : index
    %c0_3 = arith.constant 0 : index
    %7 = vector.load %arg5[%c0_2, %c0_3] : memref<128x72xf32, #tpu.memory_space<vmem>>, vector<128x8xf32>
    tpu.vector_store %arg5[%c0_2, %c0_3], %6 {strides = array<i32>} : memref<128x72xf32, #tpu.memory_space<vmem>>, vector<128x8xf32>,
    %c0_4 = arith.constant 0 : index
    %8 = arith.index_cast %2 : i32 to index
    %c1 = arith.constant 1 : index
    %c0_5 = arith.constant 0 : index
    %9 = vector.load %arg2[%c0_4, %8, %c1, %c0_5] : memref<1x18x18x8xf32, #tpu.memory_space<vmem>>, vector<1x8x16x8xf32>
    %10 = vector.shape_cast %9 : vector<1x8x16x8xf32> to vector<8x16x8xf32>
    %11 = vector.shape_cast %10 : vector<8x16x8xf32> to vector<128x8xf32>
    %c0_6 = arith.constant 0 : index
    %c8 = arith.constant 8 : index
    %12 = vector.load %arg5[%c0_6, %c8] : memref<128x72xf32, #tpu.memory_space<vmem>>, vector<128x8xf32>
    tpu.vector_store %arg5[%c0_6, %c8], %11 {strides = array<i32>} : memref<128x72xf32, #tpu.memory_space<vmem>>, vector<128x8xf32>,
    %c0_7 = arith.constant 0 : index
    %13 = arith.index_cast %2 : i32 to index
    %c2 = arith.constant 2 : index
    %c0_8 = arith.constant 0 : index
    %14 = vector.load %arg2[%c0_7, %13, %c2, %c0_8] : memref<1x18x18x8xf32, #tpu.memory_space<vmem>>, vector<1x8x16x8xf32>
    %15 = vector.shape_cast %14 : vector<1x8x16x8xf32> to vector<8x16x8xf32>
    %16 = vector.shape_cast %15 : vector<8x16x8xf32> to vector<128x8xf32>
    %c0_9 = arith.constant 0 : index
    %c16 = arith.constant 16 : index
    %17 = vector.load %arg5[%c0_9, %c16] : memref<128x72xf32, #tpu.memory_space<vmem>>, vector<128x8xf32>
    tpu.vector_store %arg5[%c0_9, %c16], %16 {strides = array<i32>} : memref<128x72xf32, #tpu.memory_space<vmem>>, vector<128x8xf32>,
    %c1_i32 = arith.constant 1 : i32
    %18 = arith.addi %1, %c1_i32 : i32
    %c0_10 = arith.constant 0 : index
    %19 = arith.index_cast %18 : i32 to index
    %c0_11 = arith.constant 0 : index
    %c0_12 = arith.constant 0 : index
    %20 = vector.load %arg2[%c0_10, %19, %c0_11, %c0_12] : memref<1x18x18x8xf32, #tpu.memory_space<vmem>>, vector<1x8x16x8xf32>
    %21 = vector.shape_cast %20 : vector<1x8x16x8xf32> to vector<8x16x8xf32>
    %22 = vector.shape_cast %21 : vector<8x16x8xf32> to vector<128x8xf32>
    %c0_13 = arith.constant 0 : index
    %c24 = arith.constant 24 : index
    %23 = vector.load %arg5[%c0_13, %c24] : memref<128x72xf32, #tpu.memory_space<vmem>>, vector<128x8xf32>
    tpu.vector_store %arg5[%c0_13, %c24], %22 {strides = array<i32>} : memref<128x72xf32, #tpu.memory_space<vmem>>, vector<128x8xf32>,
    %c0_14 = arith.constant 0 : index
    %24 = arith.index_cast %18 : i32 to index
    %c1_15 = arith.constant 1 : index
    %c0_16 = arith.constant 0 : index
    %25 = vector.load %arg2[%c0_14, %24, %c1_15, %c0_16] : memref<1x18x18x8xf32, #tpu.memory_space<vmem>>, vector<1x8x16x8xf32>
    %26 = vector.shape_cast %25 : vector<1x8x16x8xf32> to vector<8x16x8xf32>
    %27 = vector.shape_cast %26 : vector<8x16x8xf32> to vector<128x8xf32>
    %c0_17 = arith.constant 0 : index
    %c32 = arith.constant 32 : index
    %28 = vector.load %arg5[%c0_17, %c32] : memref<128x72xf32, #tpu.memory_space<vmem>>, vector<128x8xf32>
    tpu.vector_store %arg5[%c0_17, %c32], %27 {strides = array<i32>} : memref<128x72xf32, #tpu.memory_space<vmem>>, vector<128x8xf32>,
    %c0_18 = arith.constant 0 : index
    %29 = arith.index_cast %18 : i32 to index
    %c2_19 = arith.constant 2 : index
    %c0_20 = arith.constant 0 : index
    %30 = vector.load %arg2[%c0_18, %29, %c2_19, %c0_20] : memref<1x18x18x8xf32, #tpu.memory_space<vmem>>, vector<1x8x16x8xf32>
    %31 = vector.shape_cast %30 : vector<1x8x16x8xf32> to vector<8x16x8xf32>
    %32 = vector.shape_cast %31 : vector<8x16x8xf32> to vector<128x8xf32>
    %c0_21 = arith.constant 0 : index
    %c40 = arith.constant 40 : index
    %33 = vector.load %arg5[%c0_21, %c40] : memref<128x72xf32, #tpu.memory_space<vmem>>, vector<128x8xf32>
    tpu.vector_store %arg5[%c0_21, %c40], %32 {strides = array<i32>} : memref<128x72xf32, #tpu.memory_space<vmem>>, vector<128x8xf32>,
    %c2_i32 = arith.constant 2 : i32
    %34 = arith.addi %1, %c2_i32 : i32
    %c0_22 = arith.constant 0 : index
    %35 = arith.index_cast %34 : i32 to index
    %c0_23 = arith.constant 0 : index
    %c0_24 = arith.constant 0 : index
    %36 = vector.load %arg2[%c0_22, %35, %c0_23, %c0_24] : memref<1x18x18x8xf32, #tpu.memory_space<vmem>>, vector<1x8x16x8xf32>
    %37 = vector.shape_cast %36 : vector<1x8x16x8xf32> to vector<8x16x8xf32>
    %38 = vector.shape_cast %37 : vector<8x16x8xf32> to vector<128x8xf32>
    %c0_25 = arith.constant 0 : index
    %c48 = arith.constant 48 : index
    %39 = vector.load %arg5[%c0_25, %c48] : memref<128x72xf32, #tpu.memory_space<vmem>>, vector<128x8xf32>
    tpu.vector_store %arg5[%c0_25, %c48], %38 {strides = array<i32>} : memref<128x72xf32, #tpu.memory_space<vmem>>, vector<128x8xf32>,
    %c0_26 = arith.constant 0 : index
    %40 = arith.index_cast %34 : i32 to index
    %c1_27 = arith.constant 1 : index
    %c0_28 = arith.constant 0 : index
    %41 = vector.load %arg2[%c0_26, %40, %c1_27, %c0_28] : memref<1x18x18x8xf32, #tpu.memory_space<vmem>>, vector<1x8x16x8xf32>
    %42 = vector.shape_cast %41 : vector<1x8x16x8xf32> to vector<8x16x8xf32>
    %43 = vector.shape_cast %42 : vector<8x16x8xf32> to vector<128x8xf32>
    %c0_29 = arith.constant 0 : index
    %c56 = arith.constant 56 : index
    %44 = vector.load %arg5[%c0_29, %c56] : memref<128x72xf32, #tpu.memory_space<vmem>>, vector<128x8xf32>
    tpu.vector_store %arg5[%c0_29, %c56], %43 {strides = array<i32>} : memref<128x72xf32, #tpu.memory_space<vmem>>, vector<128x8xf32>,
    %c0_30 = arith.constant 0 : index
    %45 = arith.index_cast %34 : i32 to index
    %c2_31 = arith.constant 2 : index
    %c0_32 = arith.constant 0 : index
    %46 = vector.load %arg2[%c0_30, %45, %c2_31, %c0_32] : memref<1x18x18x8xf32, #tpu.memory_space<vmem>>, vector<1x8x16x8xf32>
    %47 = vector.shape_cast %46 : vector<1x8x16x8xf32> to vector<8x16x8xf32>
    %48 = vector.shape_cast %47 : vector<8x16x8xf32> to vector<128x8xf32>
    %c0_33 = arith.constant 0 : index
    %c64 = arith.constant 64 : index
    %49 = vector.load %arg5[%c0_33, %c64] : memref<128x72xf32, #tpu.memory_space<vmem>>, vector<128x8xf32>
    tpu.vector_store %arg5[%c0_33, %c64], %48 {strides = array<i32>} : memref<128x72xf32, #tpu.memory_space<vmem>>, vector<128x8xf32>,
    %c0_34 = arith.constant 0 : index
    %c0_35 = arith.constant 0 : index
    %50 = vector.load %arg5[%c0_34, %c0_35] : memref<128x72xf32, #tpu.memory_space<vmem>>, vector<128x72xf32>
    %c0_36 = arith.constant 0 : index
    %c0_37 = arith.constant 0 : index
    %51 = vector.load %arg3[%c0_36, %c0_37] : memref<72x128xf32, #tpu.memory_space<vmem>>, vector<72x128xf32>
    %cst = arith.constant dense<0.000000e+00> : vector<128x128xf32>
    %52 = tpu.matmul %50, %51, %cst {dimension_numbers = #tpu.dot_dimension_numbers<[1], [0], [0], [1], [0, 0, 1, 1], [], []>} : vector<128x72xf32>, vector<72x128xf32>, vector<128x128xf32> -> vector<128x128xf32>
    %53 = vector.extract_strided_slice %52 {offsets = [0, 0], sizes = [128, 8], strides = [1, 1]} : vector<128x128xf32> to vector<128x8xf32>
    %54 = vector.shape_cast %53 : vector<128x8xf32> to vector<8x16x8xf32>
    %c0_38 = arith.constant 0 : index
    %c0_39 = arith.constant 0 : index
    %c0_40 = arith.constant 0 : index
    %c0_41 = arith.constant 0 : index
    %55 = vector.load %arg4[%c0_38, %c0_39, %c0_40, %c0_41] : memref<1x8x16x8xf32, #tpu.memory_space<vmem>>, vector<1x8x16x8xf32>
    %56 = vector.shape_cast %55 : vector<1x8x16x8xf32> to vector<8x16x8xf32>
    %57 = vector.shape_cast %54 : vector<8x16x8xf32> to vector<1x8x16x8xf32>
    tpu.vector_store %arg4[%c0_38, %c0_39, %c0_40, %c0_41], %57 {strides = array<i32>} : memref<1x8x16x8xf32, #tpu.memory_space<vmem>>, vector<1x8x16x8xf32>,
    return
  }
  func.func @transform_0(%arg0: i32, %arg1: i32) -> (i32, i32, i32, i32) {
    %c0_i32 = arith.constant 0 : i32
    %c0_i32_0 = arith.constant 0 : i32
    %c0_i32_1 = arith.constant 0 : i32
    %c0_i32_2 = arith.constant 0 : i32
    return %arg0, %c0_i32, %c0_i32_0, %c0_i32_1 : i32, i32, i32, i32
  }
  func.func @transform_1(%arg0: i32, %arg1: i32) -> (i32, i32) {
    %c0_i32 = arith.constant 0 : i32
    %c0_i32_0 = arith.constant 0 : i32
    %c0_i32_1 = arith.constant 0 : i32
    return %c0_i32, %c0_i32_0 : i32, i32
  }
  func.func @transform_2(%arg0: i32, %arg1: i32) -> (i32, i32, i32, i32) {
    %c0_i32 = arith.constant 0 : i32
    %c0_i32_0 = arith.constant 0 : i32
    %c0_i32_1 = arith.constant 0 : i32
    return %arg0, %arg1, %c0_i32, %c0_i32_0 : i32, i32, i32, i32
  }
}

</mosaic_0001>

<bundles_post_ra>
// kernel: tpu_custom_call.1
= control target key start
LH: loop header
LB: loop body
LE: loop exit
PB: predicated region body
PF: predicated region fallthrough
CT: control target
= control target key end

     0   :  { %s1657_s9 = smov 0   ;;  %s1659_s10 = smov 0   ;;  %s2227_s0 = inlined_call_operand.vmem [shape: f32[2,18,18,8], index: 0, kind: input, shape index: {}]   ;;  %s2228_s1 = inlined_call_operand.vmem [shape: f32[72,128], index: 1, kind: input, shape index: {}]   ;;  %s2229_s2 = inlined_call_operand.vmem [shape: f32[2,16,16,8], index: 2, kind: output, shape index: {}]  }
   0x1   :  { %s1661_s11 = smov 0   ;;  %s1663_s12 = smov 0  }
   0x2   :  { %s1665_s13 = smov 0  }
   0x3 LB: > { %s21_s14 = sadd.s32 1, %s1624_s11  ;;  %s24_s15 = sadd.s32 1, %s1628_s12  ;;  %s1632_s13 = sphi %s1665_s13, %s12_s13   ;;  %s1628_s12 = sphi %s1663_s12, %s2233_s12   ;;  %s1624_s11 = sphi %s1661_s11, %s2232_s11   ;;  %s1620_s10 = sphi %s1659_s10, %s2231_s10   ;;  %s1616_s9 = sphi %s1657_s9, %s2230_s9  }
   0x4   : > { %p22_p0 = scmp.ge.s32.totalorder %s21_s14, 2  ;;  %p1326_p1 = scmp.ge.s32.totalorder %s1632_s13, 1 }
   0x5   : > { %p126_p2 = scmp.lt.s32.totalorder %s1632_s13, 5 }
   0x6   : > { %s2235_s14 = smov (%p22_p0, %s21_s14), 0  ;;  %s2237_s15 = smov (!%p22_p0, %s24_s15), %s1628_s12 }
   0x7   : > { %p127_p3 = pnand %p1326_p1, %p126_p2  ;;  %p26_p4 = scmp.ge.s32.totalorder %s2237_s15, 2 }
   0x8   : > { %p153_p5 = scmp.lt.s32.totalorder (!%p127_p3), %s1620_s10, 1  ;;  %s1333_s16 = smul.u32 (!%p127_p3), 192, %s1616_s9  ;;  %vm188_vm0 = vcmask (!%p127_p3), 64512   ;;  %v1003_v34 = vld [vmem:[%s2228_s1] sm:$0xff] (!%p127_p3)  ;;  %v1004_v35 = vld [vmem:[%s2228_s1 + $0x8] sm:$0xff] (!%p127_p3)  ;;  %v1005_v39 = vld [vmem:[%s2228_s1 + $0x10] sm:$0xff] (!%p127_p3) }
   0x9   : > { %s2239_s15 = smov (%p26_p4, %s2237_s15), 0  ;;  %130 = sbr.rel (%p127_p3) target bundleno = 612 (0x264), region = 28 }
   0xa   : > { %s1634_s22 = smov (!%p127_p3), 8   ;;  %s1635_s23 = smov (!%p127_p3), 16   ;;  %v1519_v36 = vpack.c.bf16 (!%p127_p3), %v1004_v35, %v1003_v34  ;;  %v1006_v40 = vld [vmem:[%s2228_s1 + $0x18] sm:$0xff] (!%p127_p3)  ;;  %v1007_v44 = vld [vmem:[%s2228_s1 + $0x20] sm:$0xff] (!%p127_p3)  ;;  %v1008_v45 = vld [vmem:[%s2228_s1 + $0x28] sm:$0xff] (!%p127_p3)  ;;  %vm285_vm1 = vcmask (!%p127_p3), 130112  }
   0xb   : > { %s1636_s24 = smov (!%p127_p3), 24   ;;  %s1637_s25 = smov (!%p127_p3), 32   ;;  %v1523_v41 = vpack.c.bf16 (!%p127_p3), %v1006_v40, %v1005_v39  ;;  %v1527_v46 = vpack.c.bf16 (!%p127_p3), %v1008_v45, %v1007_v44  ;;  %v1009_v47 = vld [vmem:[%s2228_s1 + $0x30] sm:$0xff] (!%p127_p3)  ;;  %v1010_v48 = vld [vmem:[%s2228_s1 + $0x38] sm:$0xff] (!%p127_p3)  ;;  %v1011_v50 = vld [vmem:[%s2228_s1 + $0x40] sm:$0xff] (!%p127_p3)  ;;  %vm382_vm2 = vcmask (!%p127_p3), 195712  }
   0xc   : > { %s1638_s26 = smov (!%p127_p3), 40   ;;  %s1639_s27 = smov (!%p127_p3), 48   ;;  %1520 = vmatprep.subr.bf16.mxu0 (!%p127_p3), %v1519_v36  ;;  %1535 = vmatprep.subr.bf16.mxu1 (!%p127_p3), %v1519_v36  ;;  %v1531_v49 = vpack.c.bf16 (!%p127_p3), %v1010_v48, %v1009_v47  ;;  %vm482_vm3 = vcmask (!%p127_p3), 261312   ;;  %vm579_vm4 = vcmask (!%p127_p3), 326912   ;;  %vm676_vm5 = vcmask (!%p127_p3), 392512  }
   0xd   : > { %s1640_s28 = smov (!%p127_p3), 56   ;;  %1522 = vmatpush3.bf16.msra.mxu0 (!%p127_p3), %v1519_v36  ;;  %1540 = vmatpush3.bf16.msra.mxu1 (!%p127_p3), %v1519_v36  ;;  %vm776_vm6 = vcmask (!%p127_p3), 458112   ;;  %vm873_vm7 = vcmask (!%p127_p3), 523712   ;;  %vm970_vm8 = vcmask (!%p127_p3), 589312   ;;  %vm1012_vm9 = vcmask (!%p127_p3), 588800  }
   0xe   : > { %1524 = vmatprep.subr.bf16.mxu0 (!%p127_p3), %v1523_v41  ;;  %1536 = vmatprep.subr.bf16.mxu1 (!%p127_p3), %v1523_v41 }
  0x10   : > { %s2241_s10 = smov (!%p153_p5, %s1620_s10), 1 }
  0x11   : > { %s1545_s17 = smul.u32 432, %s2241_s10  ;;  %1526 = vmatpush3.bf16.msra.mxu0 %v1523_v41  ;;  %1541 = vmatpush3.bf16.msra.mxu1 %v1523_v41 }
  0x12   : > { %1528 = vmatprep.subr.bf16.mxu0 %v1527_v46  ;;  %1537 = vmatprep.subr.bf16.mxu1 %v1527_v46 }
  0x13   : > { %s157_s20 = scalar_lea.vmem %s2227_s0, %s1545_s17 }
  0x14   : > { %s1696_s21 = scalar_lea.vmem %s157_s20, %s1333_s16  ;;  %s1641_s20 = smov 64  }
  0x15   : > { %v206_v0 = vld [vmem:[%s1696_s21 + $0x9] sm:$0xff]  ;;  %v205_v1 = vld [vmem:[%s1696_s21 + $0x1] sm:$0xff]  ;;  %v1709_v4 = vld [vmem:[%s1696_s21 + $0x78] sm:$0xff]  ;;  %1530 = vmatpush3.bf16.msra.mxu0 %v1527_v46  ;;  %1542 = vmatpush3.bf16.msra.mxu1 %v1527_v46 }
  0x16   : > { %239 = vrot.lane.b32.xlu1 %v206_v0, %s1634_s22  ;;  %237 = vrot.lane.b32.xlu0 %v205_v1, %s1634_s22  ;;  %v1703_v2 = vld [vmem:[%s1696_s21 + $0x69] sm:$0xff]  ;;  %v1706_v3 = vld [vmem:[%s1696_s21 + $0x61] sm:$0xff]  ;;  %199 = vst.msk [vmem:[#allocation2 + $0x50] sm:$0xff] %vm188_vm0, %v1709_v4 }
  0x17   : > { %v1336_v5 = vld [vmem:[%s1696_s21 + $0x18] sm:$0xff]  ;;  %v1713_v6 = vld [vmem:[%s1696_s21 + $0x80] sm:$0xff]  ;;  %v1731_v10 = vld [vmem:[%s1696_s21 + $0x90] sm:$0xff]  ;;  %1532 = vmatprep.subr.bf16.mxu0 %v1531_v49  ;;  %1538 = vmatprep.subr.bf16.mxu1 %v1531_v49 }
  0x18   : > { %v1337_v7 = vld [vmem:[%s1696_s21 + $0x20] sm:$0xff]  ;;  %191 = vst.msk [vmem:[#allocation2 + $0x10] sm:$0xff] %vm188_vm0, %v1336_v5  ;;  %200 = vst.msk [vmem:[#allocation2 + $0x58] sm:$0xff] %vm188_vm0, %v1713_v6  ;;  %v1734_v11 = vld [vmem:[%s1696_s21 + $0x30] sm:$0xff] }
  0x19   : > { %192 = vst.msk [vmem:[#allocation2 + $0x18] sm:$0xff] %vm188_vm0, %v1337_v7  ;;  %v1727_v8 = vld [vmem:[%s1696_s21 + $0x62] sm:$0xff]  ;;  %v1737_v12 = vld [vmem:[%s1696_s21 + $0x98] sm:$0xff]  ;;  %201 = vst.msk [vmem:[#allocation2 + $0x60] sm:$0xff] %vm188_vm0, %v1731_v10  ;;  %1534 = vmatpush3.bf16.msra.mxu0 %v1531_v49  ;;  %1543 = vmatpush3.bf16.msra.mxu1 %v1531_v49 }
  0x1a   : > { %255 = vrot.lane.b32.xlu1 %v1703_v2, %s1634_s22  ;;  %253 = vrot.lane.b32.xlu0 %v1706_v3, %s1634_s22  ;;  %v302_v9 = vld [vmem:[%s1696_s21 + $0x2] sm:$0xff]  ;;  %v1740_v13 = vld [vmem:[%s1696_s21 + $0x38] sm:$0xff]  ;;  %193 = vst.msk [vmem:[#allocation2 + $0x20] sm:$0xff] %vm188_vm0, %v1734_v11  ;;  %202 = vst.msk [vmem:[#allocation2 + $0x68] sm:$0xff] %vm188_vm0, %v1737_v12 }
  0x1b   : > { %194 = vst.msk [vmem:[#allocation2 + $0x28] sm:$0xff] %vm188_vm0, %v1740_v13  ;;  %v1754_v14 = vld [vmem:[%s1696_s21 + $0x6a] sm:$0xff]  ;;  %v172_v17 = vld [vmem:[%s1696_s21] sm:$0xff]  ;;  %v1426_v42 = vld [vmem:[%s1696_s21 + $0x92] sm:$0xff]  ;;  %1493 = vmatprep.subr.mxu0 %v1011_v50  ;;  %1539 = vmatprep.subr.mxu1 %v1011_v50 }
  0x1c   : > { %v303_v15 = vld [vmem:[%s1696_s21 + $0xa] sm:$0xff]  ;;  %189 = vst.msk [vmem:[#allocation2] sm:$0xff] %vm188_vm0, %v172_v17  ;;  %v1774_v21 = vld [vmem:[%s1696_s21 + $0x60] sm:$0xff]  ;;  %v1418_v43 = vld [vmem:[%s1696_s21 + $0x32] sm:$0xff] }
  0x1d   : > { %v173_v16 = vld [vmem:[%s1696_s21 + $0x8] sm:$0xff]  ;;  %197 = vst.msk [vmem:[#allocation2 + $0x40] sm:$0xff] %vm188_vm0, %v1774_v21  ;;  %v1785_v22 = vld [vmem:[%s1696_s21 + $0xb0] sm:$0xff]  ;;  %v1801_v24 = vld [vmem:[%s1696_s21 + $0x79] sm:$0xff]  ;;  %1494 = vmatpush3.msra.mxu0 %v1011_v50  ;;  %1544 = vmatpush3.msra.mxu1 %v1011_v50 }
  0x1e   : > { %350 = vrot.lane.b32.xlu1 %v1727_v8, %s1635_s23  ;;  %334 = vrot.lane.b32.xlu0 %v302_v9, %s1635_s23  ;;  %190 = vst.msk [vmem:[#allocation2 + $0x8] sm:$0xff] %vm188_vm0, %v173_v16  ;;  %v1761_v18 = vld [vmem:[%s1696_s21 + $0xa8] sm:$0xff]  ;;  %v1788_v23 = vld [vmem:[%s1696_s21 + $0x50] sm:$0xff]  ;;  %204 = vst.msk [vmem:[#allocation2 + $0x78] sm:$0xff] %vm188_vm0, %v1785_v22 }
  0x1f   : > { %v1764_v19 = vld [vmem:[%s1696_s21 + $0x48] sm:$0xff]  ;;  %203 = vst.msk [vmem:[#allocation2 + $0x70] sm:$0xff] %vm188_vm0, %v1761_v18  ;;  %196 = vst.msk [vmem:[#allocation2 + $0x38] sm:$0xff] %vm188_vm0, %v1788_v23  ;;  %v1352_v25 = vld [vmem:[%s1696_s21 + $0x19] sm:$0xff] }
  0x20   : > { %v1771_v20 = vld [vmem:[%s1696_s21 + $0x68] sm:$0xff]  ;;  %195 = vst.msk [vmem:[#allocation2 + $0x30] sm:$0xff] %vm188_vm0, %v1764_v19  ;;  %v1818_v28 = vld [vmem:[%s1696_s21 + $0x7a] sm:$0xff]  ;;  %v1410_v32 = vld [vmem:[%s1696_s21 + $0x91] sm:$0xff] }
  0x21   : > { %198 = vst.msk [vmem:[#allocation2 + $0x48] sm:$0xff] %vm188_vm0, %v1771_v20  ;;  %v1811_v26 = vld [vmem:[%s1696_s21 + $0x81] sm:$0xff]  ;;  %v1402_v33 = vld [vmem:[%s1696_s21 + $0x31] sm:$0xff]  ;;  %v1411_v37 = vld [vmem:[%s1696_s21 + $0x99] sm:$0xff] }
  0x22   : > { %352 = vrot.lane.b32.xlu1 %v1754_v14, %s1635_s23  ;;  %336 = vrot.lane.b32.xlu0 %v303_v15, %s1635_s23  ;;  %v1353_v27 = vld [vmem:[%s1696_s21 + $0x21] sm:$0xff]  ;;  %v1403_v38 = vld [vmem:[%s1696_s21 + $0x39] sm:$0xff] }
  0x23   : > { %v1368_v29 = vld [vmem:[%s1696_s21 + $0x1a] sm:$0xff]  ;;  %v1831_v30 = vld [vmem:[%s1696_s21 + $0x82] sm:$0xff]  ;;  %v1428_v15 = vld [vmem:[%s1696_s21 + $0xaa] sm:$0xff] }
  0x24   : > { %v1369_v31 = vld [vmem:[%s1696_s21 + $0x22] sm:$0xff]  ;;  %v1427_v51 = vld [vmem:[%s1696_s21 + $0x9a] sm:$0xff]  ;;  %v1420_v16 = vld [vmem:[%s1696_s21 + $0x4a] sm:$0xff] }
  0x25   : > { %v1419_v52 = vld [vmem:[%s1696_s21 + $0x3a] sm:$0xff]  ;;  %v1412_v61 = vld [vmem:[%s1696_s21 + $0xa9] sm:$0xff] }
  0x26   : > { %450 = vrot.lane.b32.xlu1 %v1709_v4, %s1636_s24  ;;  %434 = vrot.lane.b32.xlu0 %v1336_v5, %s1636_s24  ;;  %v1404_v62 = vld [vmem:[%s1696_s21 + $0x49] sm:$0xff]  ;;  %v1398_v41 = vld [vmem:[%s1696_s21 + $0xc0] sm:$0xff] }
  0x27   : > { %v1399_v48 = vld [vmem:[%s1696_s21 + $0xc8] sm:$0xff] }
  0x2a   : > { %452 = vrot.lane.b32.xlu1 %v1713_v6, %s1636_s24  ;;  %436 = vrot.lane.b32.xlu0 %v1337_v7, %s1636_s24 }
  0x2e   : > { %547 = vrot.lane.b32.xlu1 %v1801_v24, %s1637_s25  ;;  %531 = vrot.lane.b32.xlu0 %v1352_v25, %s1637_s25 }
  0x32   : > { %257 = vrot.lane.b32.xlu1 %v1801_v24, %s1634_s22  ;;  %241 = vrot.lane.b32.xlu0 %v1352_v25, %s1634_s22 }
  0x36   : > { %549 = vrot.lane.b32.xlu1 %v1811_v26, %s1637_s25  ;;  %533 = vrot.lane.b32.xlu0 %v1353_v27, %s1637_s25 }
  0x3a   : > { %644 = vrot.lane.b32.xlu1 %v1818_v28, %s1638_s26  ;;  %628 = vrot.lane.b32.xlu0 %v1368_v29, %s1638_s26 }
  0x3e   : > { %259 = vrot.lane.b32.xlu1 %v1811_v26, %s1634_s22  ;;  %243 = vrot.lane.b32.xlu0 %v1353_v27, %s1634_s22 }
  0x42   : > { %354 = vrot.lane.b32.xlu1 %v1818_v28, %s1635_s23  ;;  %338 = vrot.lane.b32.xlu0 %v1368_v29, %s1635_s23 }
  0x46   : > { %646 = vrot.lane.b32.xlu1 %v1831_v30, %s1638_s26  ;;  %630 = vrot.lane.b32.xlu0 %v1369_v31, %s1638_s26 }
  0x4a   : > { %744 = vrot.lane.b32.xlu1 %v1731_v10, %s1639_s27  ;;  %728 = vrot.lane.b32.xlu0 %v1734_v11, %s1639_s27 }
  0x4e   : > { %356 = vrot.lane.b32.xlu1 %v1831_v30, %s1635_s23  ;;  %340 = vrot.lane.b32.xlu0 %v1369_v31, %s1635_s23  ;;  %v1429_v31 = vld [vmem:[%s1696_s21 + $0xb2] sm:$0xff] }
  0x52   : > { %454 = vrot.lane.b32.xlu1 %v1731_v10, %s1636_s24  ;;  %438 = vrot.lane.b32.xlu0 %v1734_v11, %s1636_s24  ;;  %v1413_v10 = vld [vmem:[%s1696_s21 + $0xb1] sm:$0xff] }
  0x53   : > { %v1405_v11 = vld [vmem:[%s1696_s21 + $0x51] sm:$0xff] }
  0x56   : > { %746 = vrot.lane.b32.xlu1 %v1737_v12, %s1639_s27  ;;  %730 = vrot.lane.b32.xlu0 %v1740_v13, %s1639_s27 }
  0x5a   : > { %841 = vrot.lane.b32.xlu1 %v1410_v32, %s1640_s28  ;;  %825 = vrot.lane.b32.xlu0 %v1402_v33, %s1640_s28 }
  0x5e   : > { %456 = vrot.lane.b32.xlu1 %v1737_v12, %s1636_s24  ;;  %440 = vrot.lane.b32.xlu0 %v1740_v13, %s1636_s24 }
  0x62   : > { %551 = vrot.lane.b32.xlu1 %v1410_v32, %s1637_s25  ;;  %535 = vrot.lane.b32.xlu0 %v1402_v33, %s1637_s25 }
  0x66   : > { %843 = vrot.lane.b32.xlu1 %v1411_v37, %s1640_s28  ;;  %827 = vrot.lane.b32.xlu0 %v1403_v38, %s1640_s28 }
  0x6a   : > { %938 = vrot.lane.b32.xlu1 %v1426_v42, %s1641_s20  ;;  %922 = vrot.lane.b32.xlu0 %v1418_v43, %s1641_s20 }
  0x6e   : > { %261 = vrot.lane.b32.xlu1 %v1410_v32, %s1634_s22  ;;  %245 = vrot.lane.b32.xlu0 %v1402_v33, %s1634_s22  ;;  %v1421_v32 = vld [vmem:[%s1696_s21 + $0x52] sm:$0xff] }
  0x72   : > { %553 = vrot.lane.b32.xlu1 %v1411_v37, %s1637_s25  ;;  %537 = vrot.lane.b32.xlu0 %v1403_v38, %s1637_s25 }
  0x76   : > { %648 = vrot.lane.b32.xlu1 %v1426_v42, %s1638_s26  ;;  %632 = vrot.lane.b32.xlu0 %v1418_v43, %s1638_s26 }
  0x7a   : > { %940 = vrot.lane.b32.xlu1 %v1427_v51, %s1641_s20  ;;  %924 = vrot.lane.b32.xlu0 %v1419_v52, %s1641_s20 }
  0x7e   : > { %263 = vrot.lane.b32.xlu1 %v1411_v37, %s1634_s22  ;;  %247 = vrot.lane.b32.xlu0 %v1403_v38, %s1634_s22 }
  0x82   : > { %358 = vrot.lane.b32.xlu1 %v1426_v42, %s1635_s23  ;;  %342 = vrot.lane.b32.xlu0 %v1418_v43, %s1635_s23 }
  0x86   : > { %650 = vrot.lane.b32.xlu1 %v1427_v51, %s1638_s26  ;;  %634 = vrot.lane.b32.xlu0 %v1419_v52, %s1638_s26 }
  0x88   : > { %v240_v53 = vpop.permute.xlu1 %239  ;;  %v238_v54 = vpop.permute.xlu0 %237 }
  0x89   : > { %287 = vst.msk [vmem:[#allocation2 + $0x8] sm:$0xff] %vm285_vm1, %v240_v53  ;;  %286 = vst.msk [vmem:[#allocation2] sm:$0xff] %vm285_vm1, %v238_v54 }
  0x8a   : > { %748 = vrot.lane.b32.xlu1 %v1761_v18, %s1639_s27  ;;  %732 = vrot.lane.b32.xlu0 %v1764_v19, %s1639_s27 }
  0x8c   : > { %v256_v55 = vpop.permute.xlu1 %255  ;;  %v254_v56 = vpop.permute.xlu0 %253 }
  0x8d   : > { %295 = vst.msk [vmem:[#allocation2 + $0x48] sm:$0xff] %vm285_vm1, %v256_v55  ;;  %294 = vst.msk [vmem:[#allocation2 + $0x40] sm:$0xff] %vm285_vm1, %v254_v56 }
  0x8e   : > { %360 = vrot.lane.b32.xlu1 %v1427_v51, %s1635_s23  ;;  %344 = vrot.lane.b32.xlu0 %v1419_v52, %s1635_s23  ;;  %v1414_v51 = vld [vmem:[%s1696_s21 + $0xc1] sm:$0xff] }
  0x90   : > { %v351_v57 = vpop.permute.xlu1 %350  ;;  %v335_v58 = vpop.permute.xlu0 %334 }
  0x91   : > { %391 = vst.msk [vmem:[#allocation2 + $0x40] sm:$0xff] %vm382_vm2, %v351_v57  ;;  %383 = vst.msk [vmem:[#allocation2] sm:$0xff] %vm382_vm2, %v335_v58  ;;  %v1415_v57 = vld [vmem:[%s1696_s21 + $0xc9] sm:$0xff] }
  0x92   : > { %458 = vrot.lane.b32.xlu1 %v1761_v18, %s1636_s24  ;;  %442 = vrot.lane.b32.xlu0 %v1764_v19, %s1636_s24 }
  0x94   : > { %v353_v59 = vpop.permute.xlu1 %352  ;;  %v337_v60 = vpop.permute.xlu0 %336 }
  0x95   : > { %392 = vst.msk [vmem:[#allocation2 + $0x48] sm:$0xff] %vm382_vm2, %v353_v59  ;;  %384 = vst.msk [vmem:[#allocation2 + $0x8] sm:$0xff] %vm382_vm2, %v337_v60 }
  0x96   : > { %750 = vrot.lane.b32.xlu1 %v1785_v22, %s1639_s27  ;;  %734 = vrot.lane.b32.xlu0 %v1788_v23, %s1639_s27 }
  0x98   : > { %v451_v63 = vpop.permute.xlu1 %450  ;;  %v435_v0 = vpop.permute.xlu0 %434 }
  0x99   : > { %491 = vst.msk [vmem:[#allocation2 + $0x40] sm:$0xff] %vm482_vm3, %v451_v63  ;;  %483 = vst.msk [vmem:[#allocation2] sm:$0xff] %vm482_vm3, %v435_v0 }
  0x9a   : > { %845 = vrot.lane.b32.xlu1 %v1412_v61, %s1640_s28  ;;  %829 = vrot.lane.b32.xlu0 %v1404_v62, %s1640_s28 }
  0x9c   : > { %v453_v1 = vpop.permute.xlu1 %452  ;;  %v437_v5 = vpop.permute.xlu0 %436 }
  0x9d   : > { %492 = vst.msk [vmem:[#allocation2 + $0x48] sm:$0xff] %vm482_vm3, %v453_v1  ;;  %484 = vst.msk [vmem:[#allocation2 + $0x8] sm:$0xff] %vm482_vm3, %v437_v5 }
  0x9e   : > { %460 = vrot.lane.b32.xlu1 %v1785_v22, %s1636_s24  ;;  %444 = vrot.lane.b32.xlu0 %v1788_v23, %s1636_s24 }
  0xa0   : > { %v548_v7 = vpop.permute.xlu1 %547  ;;  %v532_v9 = vpop.permute.xlu0 %531 }
  0xa1   : > { %588 = vst.msk [vmem:[#allocation2 + $0x40] sm:$0xff] %vm579_vm4, %v548_v7  ;;  %580 = vst.msk [vmem:[#allocation2] sm:$0xff] %vm579_vm4, %v532_v9  ;;  %v1431_v7 = vld [vmem:[%s1696_s21 + $0xca] sm:$0xff] }
  0xa2   : > { %555 = vrot.lane.b32.xlu1 %v1412_v61, %s1637_s25  ;;  %539 = vrot.lane.b32.xlu0 %v1404_v62, %s1637_s25 }
  0xa4   : > { %v258_v12 = vpop.permute.xlu1 %257  ;;  %v242_v13 = vpop.permute.xlu0 %241 }
  0xa5   : > { %296 = vst.msk [vmem:[#allocation2 + $0x50] sm:$0xff] %vm285_vm1, %v258_v12  ;;  %288 = vst.msk [vmem:[#allocation2 + $0x10] sm:$0xff] %vm285_vm1, %v242_v13  ;;  %v1400_v13 = vld [vmem:[%s1696_s21 + $0xd8] sm:$0xff] }
  0xa6   : > { %847 = vrot.lane.b32.xlu1 %v1413_v10, %s1640_s28  ;;  %831 = vrot.lane.b32.xlu0 %v1405_v11, %s1640_s28 }
  0xa8   : > { %v550_v17 = vpop.permute.xlu1 %549  ;;  %v534_v18 = vpop.permute.xlu0 %533 }
  0xa9   : > { %589 = vst.msk [vmem:[#allocation2 + $0x48] sm:$0xff] %vm579_vm4, %v550_v17  ;;  %581 = vst.msk [vmem:[#allocation2 + $0x8] sm:$0xff] %vm579_vm4, %v534_v18  ;;  %v1401_v17 = vld [vmem:[%s1696_s21 + $0xe0] sm:$0xff] }
  0xaa   : > { %942 = vrot.lane.b32.xlu1 %v1428_v15, %s1641_s20  ;;  %926 = vrot.lane.b32.xlu0 %v1420_v16, %s1641_s20 }
  0xac   : > { %v645_v19 = vpop.permute.xlu1 %644  ;;  %v629_v22 = vpop.permute.xlu0 %628 }
  0xad   : > { %685 = vst.msk [vmem:[#allocation2 + $0x40] sm:$0xff] %vm676_vm5, %v645_v19  ;;  %677 = vst.msk [vmem:[#allocation2] sm:$0xff] %vm676_vm5, %v629_v22 }
  0xae   : > { %265 = vrot.lane.b32.xlu1 %v1412_v61, %s1634_s22  ;;  %249 = vrot.lane.b32.xlu0 %v1404_v62, %s1634_s22 }
  0xb0   : > { %v260_v23 = vpop.permute.xlu1 %259  ;;  %v244_v25 = vpop.permute.xlu0 %243 }
  0xb1   : > { %297 = vst.msk [vmem:[#allocation2 + $0x58] sm:$0xff] %vm285_vm1, %v260_v23  ;;  %289 = vst.msk [vmem:[#allocation2 + $0x18] sm:$0xff] %vm285_vm1, %v244_v25 }
  0xb2   : > { %557 = vrot.lane.b32.xlu1 %v1413_v10, %s1637_s25  ;;  %541 = vrot.lane.b32.xlu0 %v1405_v11, %s1637_s25 }
  0xb4   : > { %v355_v27 = vpop.permute.xlu1 %354  ;;  %v339_v29 = vpop.permute.xlu0 %338 }
  0xb5   : > { %393 = vst.msk [vmem:[#allocation2 + $0x50] sm:$0xff] %vm382_vm2, %v355_v27  ;;  %385 = vst.msk [vmem:[#allocation2 + $0x10] sm:$0xff] %vm382_vm2, %v339_v29 }
  0xb6   : > { %652 = vrot.lane.b32.xlu1 %v1428_v15, %s1638_s26  ;;  %636 = vrot.lane.b32.xlu0 %v1420_v16, %s1638_s26 }
  0xb8   : > { %v647_v33 = vpop.permute.xlu1 %646  ;;  %v631_v34 = vpop.permute.xlu0 %630 }
  0xb9   : > { %686 = vst.msk [vmem:[#allocation2 + $0x48] sm:$0xff] %vm676_vm5, %v647_v33  ;;  %678 = vst.msk [vmem:[#allocation2 + $0x8] sm:$0xff] %vm676_vm5, %v631_v34 }
  0xba   : > { %944 = vrot.lane.b32.xlu1 %v1429_v31, %s1641_s20  ;;  %928 = vrot.lane.b32.xlu0 %v1421_v32, %s1641_s20 }
  0xbc   : > { %v745_v35 = vpop.permute.xlu1 %744  ;;  %v729_v36 = vpop.permute.xlu0 %728 }
  0xbd   : > { %785 = vst.msk [vmem:[#allocation2 + $0x40] sm:$0xff] %vm776_vm6, %v745_v35  ;;  %777 = vst.msk [vmem:[#allocation2] sm:$0xff] %vm776_vm6, %v729_v36 }
  0xbe   : > { %267 = vrot.lane.b32.xlu1 %v1413_v10, %s1634_s22  ;;  %251 = vrot.lane.b32.xlu0 %v1405_v11, %s1634_s22 }
  0xc0   : > { %v357_v37 = vpop.permute.xlu1 %356  ;;  %v341_v38 = vpop.permute.xlu0 %340 }
  0xc1   : > { %394 = vst.msk [vmem:[#allocation2 + $0x58] sm:$0xff] %vm382_vm2, %v357_v37  ;;  %386 = vst.msk [vmem:[#allocation2 + $0x18] sm:$0xff] %vm382_vm2, %v341_v38 }
  0xc2   : > { %362 = vrot.lane.b32.xlu1 %v1428_v15, %s1635_s23  ;;  %346 = vrot.lane.b32.xlu0 %v1420_v16, %s1635_s23 }
  0xc4   : > { %v455_v39 = vpop.permute.xlu1 %454  ;;  %v439_v40 = vpop.permute.xlu0 %438 }
  0xc5   : > { %493 = vst.msk [vmem:[#allocation2 + $0x50] sm:$0xff] %vm482_vm3, %v455_v39  ;;  %485 = vst.msk [vmem:[#allocation2 + $0x10] sm:$0xff] %vm482_vm3, %v439_v40 }
  0xc6   : > { %654 = vrot.lane.b32.xlu1 %v1429_v31, %s1638_s26  ;;  %638 = vrot.lane.b32.xlu0 %v1421_v32, %s1638_s26 }
  0xc8   : > { %v747_v42 = vpop.permute.xlu1 %746  ;;  %v731_v43 = vpop.permute.xlu0 %730 }
  0xc9   : > { %786 = vst.msk [vmem:[#allocation2 + $0x48] sm:$0xff] %vm776_vm6, %v747_v42  ;;  %778 = vst.msk [vmem:[#allocation2 + $0x8] sm:$0xff] %vm776_vm6, %v731_v43 }
  0xca   : > { %752 = vrot.lane.b32.xlu1 %v1398_v41, %s1639_s27  ;;  %736 = vrot.lane.b32.xlu0 %v1774_v21, %s1639_s27 }
  0xcc   : > { %v842_v44 = vpop.permute.xlu1 %841  ;;  %v826_v45 = vpop.permute.xlu0 %825 }
  0xcd   : > { %882 = vst.msk [vmem:[#allocation2 + $0x40] sm:$0xff] %vm873_vm7, %v842_v44  ;;  %874 = vst.msk [vmem:[#allocation2] sm:$0xff] %vm873_vm7, %v826_v45 }
  0xce   : > { %364 = vrot.lane.b32.xlu1 %v1429_v31, %s1635_s23  ;;  %348 = vrot.lane.b32.xlu0 %v1421_v32, %s1635_s23  ;;  %s1330_s23 = sshll.u32 %s2241_s10, 5 }
  0xd0   : > { %v457_v46 = vpop.permute.xlu1 %456  ;;  %v441_v47 = vpop.permute.xlu0 %440 }
  0xd1   : > { %494 = vst.msk [vmem:[#allocation2 + $0x58] sm:$0xff] %vm482_vm3, %v457_v46  ;;  %486 = vst.msk [vmem:[#allocation2 + $0x18] sm:$0xff] %vm482_vm3, %v441_v47 }
  0xd2   : > { %462 = vrot.lane.b32.xlu1 %v1398_v41, %s1636_s24  ;;  %446 = vrot.lane.b32.xlu0 %v1774_v21, %s1636_s24 }
  0xd4   : > { %v552_v49 = vpop.permute.xlu1 %551  ;;  %v536_v50 = vpop.permute.xlu0 %535 }
  0xd5   : > { %590 = vst.msk [vmem:[#allocation2 + $0x50] sm:$0xff] %vm579_vm4, %v552_v49  ;;  %582 = vst.msk [vmem:[#allocation2 + $0x10] sm:$0xff] %vm579_vm4, %v536_v50 }
  0xd6   : > { %754 = vrot.lane.b32.xlu1 %v1399_v48, %s1639_s27  ;;  %738 = vrot.lane.b32.xlu0 %v1771_v20, %s1639_s27 }
  0xd8   : > { %v844_v52 = vpop.permute.xlu1 %843  ;;  %v828_v53 = vpop.permute.xlu0 %827 }
  0xd9   : > { %883 = vst.msk [vmem:[#allocation2 + $0x48] sm:$0xff] %vm873_vm7, %v844_v52  ;;  %875 = vst.msk [vmem:[#allocation2 + $0x8] sm:$0xff] %vm873_vm7, %v828_v53 }
  0xda   : > { %849 = vrot.lane.b32.xlu1 %v1414_v51, %s1640_s28  ;;  %833 = vrot.lane.b32.xlu0 %v1706_v3, %s1640_s28 }
  0xdc   : > { %v939_v21 = vpop.permute.xlu1 %938  ;;  %v923_v54 = vpop.permute.xlu0 %922 }
  0xdd   : > { %979 = vst.msk [vmem:[#allocation2 + $0x40] sm:$0xff] %vm970_vm8, %v939_v21  ;;  %971 = vst.msk [vmem:[#allocation2] sm:$0xff] %vm970_vm8, %v923_v54 }
  0xde   : > { %464 = vrot.lane.b32.xlu1 %v1399_v48, %s1636_s24  ;;  %448 = vrot.lane.b32.xlu0 %v1771_v20, %s1636_s24 }
  0xe0   : > { %v262_v55 = vpop.permute.xlu1 %261  ;;  %v246_v56 = vpop.permute.xlu0 %245 }
  0xe1   : > { %298 = vst.msk [vmem:[#allocation2 + $0x60] sm:$0xff] %vm285_vm1, %v262_v55  ;;  %290 = vst.msk [vmem:[#allocation2 + $0x20] sm:$0xff] %vm285_vm1, %v246_v56 }
  0xe2   : > { %559 = vrot.lane.b32.xlu1 %v1414_v51, %s1637_s25  ;;  %543 = vrot.lane.b32.xlu0 %v1706_v3, %s1637_s25  ;;  %v1430_v3 = vld [vmem:[%s1696_s21 + $0xc2] sm:$0xff] }
  0xe4   : > { %v554_v58 = vpop.permute.xlu1 %553  ;;  %v538_v59 = vpop.permute.xlu0 %537  ;;  %v987_v60 = vld [vmem:[#allocation2] sm:$0xff] }
  0xe5   : > { %v995_v61 = vld [vmem:[#allocation2 + $0x40] sm:$0xff]  ;;  %591 = vst.msk [vmem:[#allocation2 + $0x58] sm:$0xff] %vm579_vm4, %v554_v58  ;;  %583 = vst.msk [vmem:[#allocation2 + $0x18] sm:$0xff] %vm579_vm4, %v538_v59  ;;  %1495 = vmatprep.mubr.msk.f32.mxu0 %vm1012_vm9, %v987_v60 }
  0xe6   : > { %1507 = vmatprep.mubr.msk.f32.mxu1 %vm1012_vm9, %v995_v61  ;;  %851 = vrot.lane.b32.xlu1 %v1415_v57, %s1640_s28 }
  0xe7   : > { %835 = vrot.lane.b32.xlu0 %v1703_v2, %s1640_s28 }
  0xe8   : > { %v649_v20 = vpop.permute.xlu1 %648  ;;  %v633_v62 = vpop.permute.xlu0 %632 }
  0xe9   : > { %687 = vst.msk [vmem:[#allocation2 + $0x50] sm:$0xff] %vm676_vm5, %v649_v20  ;;  %679 = vst.msk [vmem:[#allocation2 + $0x10] sm:$0xff] %vm676_vm5, %v633_v62 }
  0xea   : > { %946 = vrot.lane.b32.xlu1 %v1430_v3, %s1641_s20 }
  0xeb   : > { %930 = vrot.lane.b32.xlu0 %v1727_v8, %s1641_s20 }
  0xec   : > { %v941_v63 = vpop.permute.xlu1 %940  ;;  %v925_v0 = vpop.permute.xlu0 %924 }
  0xed   : > { %980 = vst.msk [vmem:[#allocation2 + $0x48] sm:$0xff] %vm970_vm8, %v941_v63  ;;  %972 = vst.msk [vmem:[#allocation2 + $0x8] sm:$0xff] %vm970_vm8, %v925_v0 }
  0xee   : > { %561 = vrot.lane.b32.xlu1 %v1415_v57, %s1637_s25 }
  0xef   : > { %545 = vrot.lane.b32.xlu0 %v1703_v2, %s1637_s25 }
  0xf0   : > { %v264_v1 = vpop.permute.xlu1 %263  ;;  %v248_v5 = vpop.permute.xlu0 %247 }
  0xf1   : > { %299 = vst.msk [vmem:[#allocation2 + $0x68] sm:$0xff] %vm285_vm1, %v264_v1  ;;  %291 = vst.msk [vmem:[#allocation2 + $0x28] sm:$0xff] %vm285_vm1, %v248_v5 }
  0xf2   : > { %656 = vrot.lane.b32.xlu1 %v1430_v3, %s1638_s26 }
  0xf3   : > { %640 = vrot.lane.b32.xlu0 %v1727_v8, %s1638_s26 }
  0xf4   : > { %v359_v9 = vpop.permute.xlu1 %358  ;;  %v343_v10 = vpop.permute.xlu0 %342  ;;  %v988_v11 = vld [vmem:[#allocation2 + $0x8] sm:$0xff] }
  0xf5   : > { %v996_v12 = vld [vmem:[#allocation2 + $0x48] sm:$0xff]  ;;  %395 = vst.msk [vmem:[#allocation2 + $0x60] sm:$0xff] %vm382_vm2, %v359_v9  ;;  %387 = vst.msk [vmem:[#allocation2 + $0x20] sm:$0xff] %vm382_vm2, %v343_v10  ;;  %1496 = vmatmul.mubr.msk.f32.vlgmr.msra.gmra.mrb[0].mxu0 %vm1012_vm9, %v988_v11 }
  0xf6   : > { %1508 = vmatmul.mubr.msk.f32.vlgmr.msra.gmra.mrb[0].mxu1 %vm1012_vm9, %v996_v12  ;;  %948 = vrot.lane.b32.xlu1 %v1431_v7, %s1641_s20 }
  0xf7   : > { %932 = vrot.lane.b32.xlu0 %v1754_v14, %s1641_s20 }
  0xf8   : > { %v651_v2 = vpop.permute.xlu1 %650  ;;  %v635_v8 = vpop.permute.xlu0 %634 }
  0xf9   : > { %688 = vst.msk [vmem:[#allocation2 + $0x58] sm:$0xff] %vm676_vm5, %v651_v2  ;;  %680 = vst.msk [vmem:[#allocation2 + $0x18] sm:$0xff] %vm676_vm5, %v635_v8 }
  0xfa   : > { %658 = vrot.lane.b32.xlu1 %v1431_v7, %s1638_s26 }
  0xfb   : > { %642 = vrot.lane.b32.xlu0 %v1754_v14, %s1638_s26  ;;  %v1416_v14 = vld [vmem:[%s1696_s21 + $0xd9] sm:$0xff] }
  0xfc   : > { %v749_v15 = vpop.permute.xlu1 %748  ;;  %v733_v16 = vpop.permute.xlu0 %732 }
  0xfd   : > { %787 = vst.msk [vmem:[#allocation2 + $0x50] sm:$0xff] %vm776_vm6, %v749_v15  ;;  %779 = vst.msk [vmem:[#allocation2 + $0x10] sm:$0xff] %vm776_vm6, %v733_v16 }
  0xfe   : > { %756 = vrot.lane.b32.xlu1 %v1400_v13, %s1639_s27 }
  0xff   : > { %740 = vrot.lane.b32.xlu0 %v1709_v4, %s1639_s27  ;;  %v1417_v4 = vld [vmem:[%s1696_s21 + $0xe1] sm:$0xff] }
 0x100   : > { %v361_v18 = vpop.permute.xlu1 %360  ;;  %v345_v19 = vpop.permute.xlu0 %344 }
 0x101   : > { %396 = vst.msk [vmem:[#allocation2 + $0x68] sm:$0xff] %vm382_vm2, %v361_v18  ;;  %388 = vst.msk [vmem:[#allocation2 + $0x28] sm:$0xff] %vm382_vm2, %v345_v19 }
 0x102   : > { %758 = vrot.lane.b32.xlu1 %v1401_v17, %s1639_s27 }
 0x103   : > { %742 = vrot.lane.b32.xlu0 %v1713_v6, %s1639_s27  ;;  %v1432_v6 = vld [vmem:[%s1696_s21 + $0xda] sm:$0xff] }
 0x104   : > { %v459_v22 = vpop.permute.xlu1 %458  ;;  %v443_v23 = vpop.permute.xlu0 %442 }
 0x105   : > { %495 = vst.msk [vmem:[#allocation2 + $0x60] sm:$0xff] %vm482_vm3, %v459_v22  ;;  %487 = vst.msk [vmem:[#allocation2 + $0x20] sm:$0xff] %vm482_vm3, %v443_v23 }
 0x106   : > { %853 = vrot.lane.b32.xlu1 %v1416_v14, %s1640_s28 }
 0x107   : > { %837 = vrot.lane.b32.xlu0 %v1801_v24, %s1640_s28  ;;  %v1433_v24 = vld [vmem:[%s1696_s21 + $0xe2] sm:$0xff]  ;;  %s1328_s21 = sshll.u32 %s1616_s9, 3 }
 0x108   : > { %v751_v25 = vpop.permute.xlu1 %750  ;;  %v735_v27 = vpop.permute.xlu0 %734  ;;  %p161_p6 = scmp.lt.s32.totalorder %s1328_s21, 15 }
 0x109   : > { %788 = vst.msk [vmem:[#allocation2 + $0x58] sm:$0xff] %vm776_vm6, %v751_v25  ;;  %780 = vst.msk [vmem:[#allocation2 + $0x18] sm:$0xff] %vm776_vm6, %v735_v27 }
 0x10a   : > { %855 = vrot.lane.b32.xlu1 %v1417_v4, %s1640_s28  ;;  %s2243_s21 = smov (!%p161_p6, %s1328_s21), 15 }
 0x10b   : > { %839 = vrot.lane.b32.xlu0 %v1811_v26, %s1640_s28  ;;  %s1329_s22 = sshll.u32 %s2243_s21, 1 }
 0x10c   : > { %v846_v29 = vpop.permute.xlu1 %845  ;;  %v830_v31 = vpop.permute.xlu0 %829  ;;  %s165_s24 = sadd.s32 %s1330_s23, %s1329_s22 }
 0x10d   : > { %884 = vst.msk [vmem:[#allocation2 + $0x50] sm:$0xff] %vm873_vm7, %v846_v29  ;;  %876 = vst.msk [vmem:[#allocation2 + $0x10] sm:$0xff] %vm873_vm7, %v830_v31  ;;  %s1331_s25 = sshll.u32 %s165_s24, 3 }
 0x10e   : > { %950 = vrot.lane.b32.xlu1 %v1432_v6, %s1641_s20  ;;  %s2178_s28 = scalar_lea.vmem %s2229_s2, %s1331_s25 }
 0x10f   : > { %934 = vrot.lane.b32.xlu0 %v1818_v28, %s1641_s20 }
 0x110   : > { %v461_v32 = vpop.permute.xlu1 %460  ;;  %v445_v33 = vpop.permute.xlu0 %444 }
 0x111   : > { %496 = vst.msk [vmem:[#allocation2 + $0x68] sm:$0xff] %vm482_vm3, %v461_v32  ;;  %488 = vst.msk [vmem:[#allocation2 + $0x28] sm:$0xff] %vm482_vm3, %v445_v33 }
 0x112   : > { %952 = vrot.lane.b32.xlu1 %v1433_v24, %s1641_s20 }
 0x113   : > { %936 = vrot.lane.b32.xlu0 %v1831_v30, %s1641_s20 }
 0x114   : > { %v556_v26 = vpop.permute.xlu1 %555  ;;  %v540_v34 = vpop.permute.xlu0 %539 }
 0x115   : > { %592 = vst.msk [vmem:[#allocation2 + $0x60] sm:$0xff] %vm579_vm4, %v556_v26  ;;  %584 = vst.msk [vmem:[#allocation2 + $0x20] sm:$0xff] %vm579_vm4, %v540_v34 }
 0x118   : > { %v848_v35 = vpop.permute.xlu1 %847  ;;  %v832_v28 = vpop.permute.xlu0 %831 }
 0x119   : > { %885 = vst.msk [vmem:[#allocation2 + $0x58] sm:$0xff] %vm873_vm7, %v848_v35  ;;  %877 = vst.msk [vmem:[#allocation2 + $0x18] sm:$0xff] %vm873_vm7, %v832_v28 }
 0x11c   : > { %v943_v36 = vpop.permute.xlu1 %942  ;;  %v927_v37 = vpop.permute.xlu0 %926 }
 0x11d   : > { %981 = vst.msk [vmem:[#allocation2 + $0x50] sm:$0xff] %vm970_vm8, %v943_v36  ;;  %973 = vst.msk [vmem:[#allocation2 + $0x10] sm:$0xff] %vm970_vm8, %v927_v37 }
 0x120   : > { %v266_v38 = vpop.permute.xlu1 %265  ;;  %v250_v30 = vpop.permute.xlu0 %249 }
 0x121   : > { %300 = vst.msk [vmem:[#allocation2 + $0x70] sm:$0xff] %vm285_vm1, %v266_v38  ;;  %292 = vst.msk [vmem:[#allocation2 + $0x30] sm:$0xff] %vm285_vm1, %v250_v30 }
 0x124   : > { %v558_v39 = vpop.permute.xlu1 %557  ;;  %v542_v40 = vpop.permute.xlu0 %541  ;;  %v989_v41 = vld [vmem:[#allocation2 + $0x10] sm:$0xff] }
 0x125   : > { %v997_v42 = vld [vmem:[#allocation2 + $0x50] sm:$0xff]  ;;  %593 = vst.msk [vmem:[#allocation2 + $0x68] sm:$0xff] %vm579_vm4, %v558_v39  ;;  %585 = vst.msk [vmem:[#allocation2 + $0x28] sm:$0xff] %vm579_vm4, %v542_v40  ;;  %1498 = vmatprep.mubr.msk.f32.mxu0 %vm1012_vm9, %v989_v41 }
 0x126   : > { %1510 = vmatprep.mubr.msk.f32.mxu1 %vm1012_vm9, %v997_v42 }
 0x128   : > { %v653_v43 = vpop.permute.xlu1 %652  ;;  %v637_v44 = vpop.permute.xlu0 %636 }
 0x129   : > { %689 = vst.msk [vmem:[#allocation2 + $0x60] sm:$0xff] %vm676_vm5, %v653_v43  ;;  %681 = vst.msk [vmem:[#allocation2 + $0x20] sm:$0xff] %vm676_vm5, %v637_v44 }
 0x12c   : > { %v945_v45 = vpop.permute.xlu1 %944  ;;  %v929_v46 = vpop.permute.xlu0 %928 }
 0x12d   : > { %982 = vst.msk [vmem:[#allocation2 + $0x58] sm:$0xff] %vm970_vm8, %v945_v45  ;;  %974 = vst.msk [vmem:[#allocation2 + $0x18] sm:$0xff] %vm970_vm8, %v929_v46 }
 0x130   : > { %v268_v47 = vpop.permute.xlu1 %267  ;;  %v252_v48 = vpop.permute.xlu0 %251 }
 0x131   : > { %301 = vst.msk [vmem:[#allocation2 + $0x78] sm:$0xff] %vm285_vm1, %v268_v47  ;;  %293 = vst.msk [vmem:[#allocation2 + $0x38] sm:$0xff] %vm285_vm1, %v252_v48 }
 0x134   : > { %v363_v49 = vpop.permute.xlu1 %362  ;;  %v347_v50 = vpop.permute.xlu0 %346  ;;  %v990_v51 = vld [vmem:[#allocation2 + $0x18] sm:$0xff] }
 0x135   : > { %v998_v52 = vld [vmem:[#allocation2 + $0x58] sm:$0xff]  ;;  %397 = vst.msk [vmem:[#allocation2 + $0x70] sm:$0xff] %vm382_vm2, %v363_v49  ;;  %389 = vst.msk [vmem:[#allocation2 + $0x30] sm:$0xff] %vm382_vm2, %v347_v50  ;;  %1499 = vmatmul.mubr.msk.f32.gmra.mrb[2].mxu0 %vm1012_vm9, %v990_v51 }
 0x136   : > { %1511 = vmatmul.mubr.msk.f32.gmra.mrb[2].mxu1 %vm1012_vm9, %v998_v52 }
 0x138   : > { %v655_v53 = vpop.permute.xlu1 %654  ;;  %v639_v21 = vpop.permute.xlu0 %638 }
 0x139   : > { %690 = vst.msk [vmem:[#allocation2 + $0x68] sm:$0xff] %vm676_vm5, %v655_v53  ;;  %682 = vst.msk [vmem:[#allocation2 + $0x28] sm:$0xff] %vm676_vm5, %v639_v21 }
 0x13c   : > { %v753_v54 = vpop.permute.xlu1 %752  ;;  %v737_v55 = vpop.permute.xlu0 %736 }
 0x13d   : > { %789 = vst.msk [vmem:[#allocation2 + $0x60] sm:$0xff] %vm776_vm6, %v753_v54  ;;  %781 = vst.msk [vmem:[#allocation2 + $0x20] sm:$0xff] %vm776_vm6, %v737_v55 }
 0x140   : > { %v365_v56 = vpop.permute.xlu1 %364  ;;  %v349_v57 = vpop.permute.xlu0 %348 }
 0x141   : > { %398 = vst.msk [vmem:[#allocation2 + $0x78] sm:$0xff] %vm382_vm2, %v365_v56  ;;  %390 = vst.msk [vmem:[#allocation2 + $0x38] sm:$0xff] %vm382_vm2, %v349_v57 }
 0x144   : > { %v463_v58 = vpop.permute.xlu1 %462  ;;  %v447_v59 = vpop.permute.xlu0 %446 }
 0x145   : > { %497 = vst.msk [vmem:[#allocation2 + $0x70] sm:$0xff] %vm482_vm3, %v463_v58  ;;  %489 = vst.msk [vmem:[#allocation2 + $0x30] sm:$0xff] %vm482_vm3, %v447_v59 }
 0x148   : > { %v755_v60 = vpop.permute.xlu1 %754  ;;  %v739_v61 = vpop.permute.xlu0 %738 }
 0x149   : > { %790 = vst.msk [vmem:[#allocation2 + $0x68] sm:$0xff] %vm776_vm6, %v755_v60  ;;  %782 = vst.msk [vmem:[#allocation2 + $0x28] sm:$0xff] %vm776_vm6, %v739_v61 }
 0x14c   : > { %v850_v3 = vpop.permute.xlu1 %849  ;;  %v834_v20 = vpop.permute.xlu0 %833 }
 0x14d   : > { %886 = vst.msk [vmem:[#allocation2 + $0x60] sm:$0xff] %vm873_vm7, %v850_v3  ;;  %878 = vst.msk [vmem:[#allocation2 + $0x20] sm:$0xff] %vm873_vm7, %v834_v20 }
 0x150   : > { %v465_v62 = vpop.permute.xlu1 %464  ;;  %v449_v63 = vpop.permute.xlu0 %448 }
 0x151   : > { %498 = vst.msk [vmem:[#allocation2 + $0x78] sm:$0xff] %vm482_vm3, %v465_v62  ;;  %490 = vst.msk [vmem:[#allocation2 + $0x38] sm:$0xff] %vm482_vm3, %v449_v63 }
 0x154   : > { %v560_v0 = vpop.permute.xlu1 %559  ;;  %v544_v1 = vpop.permute.xlu0 %543 }
 0x155   : > { %594 = vst.msk [vmem:[#allocation2 + $0x70] sm:$0xff] %vm579_vm4, %v560_v0  ;;  %586 = vst.msk [vmem:[#allocation2 + $0x30] sm:$0xff] %vm579_vm4, %v544_v1 }
 0x158   : > { %v852_v5 = vpop.permute.xlu1 %851 }
 0x159   : > { %v836_v7 = vpop.permute.xlu0 %835  ;;  %887 = vst.msk [vmem:[#allocation2 + $0x68] sm:$0xff] %vm873_vm7, %v852_v5 }
 0x15a   : > { %879 = vst.msk [vmem:[#allocation2 + $0x28] sm:$0xff] %vm873_vm7, %v836_v7 }
 0x15c   : > { %v947_v9 = vpop.permute.xlu1 %946 }
 0x15d   : > { %v931_v10 = vpop.permute.xlu0 %930  ;;  %983 = vst.msk [vmem:[#allocation2 + $0x60] sm:$0xff] %vm970_vm8, %v947_v9 }
 0x15e   : > { %975 = vst.msk [vmem:[#allocation2 + $0x20] sm:$0xff] %vm970_vm8, %v931_v10 }
 0x160   : > { %v562_v11 = vpop.permute.xlu1 %561 }
 0x161   : > { %v546_v12 = vpop.permute.xlu0 %545  ;;  %595 = vst.msk [vmem:[#allocation2 + $0x78] sm:$0xff] %vm579_vm4, %v562_v11 }
 0x162   : > { %587 = vst.msk [vmem:[#allocation2 + $0x38] sm:$0xff] %vm579_vm4, %v546_v12 }
 0x164   : > { %v657_v2 = vpop.permute.xlu1 %656  ;;  %v999_v15 = vld [vmem:[#allocation2 + $0x60] sm:$0xff] }
 0x165   : > { %v641_v8 = vpop.permute.xlu0 %640  ;;  %v991_v13 = vld [vmem:[#allocation2 + $0x20] sm:$0xff]  ;;  %691 = vst.msk [vmem:[#allocation2 + $0x70] sm:$0xff] %vm676_vm5, %v657_v2  ;;  %1513 = vmatprep.mubr.msk.f32.mxu1 %vm1012_vm9, %v999_v15 }
 0x166   : > { %683 = vst.msk [vmem:[#allocation2 + $0x30] sm:$0xff] %vm676_vm5, %v641_v8  ;;  %1501 = vmatprep.mubr.msk.f32.mxu0 %vm1012_vm9, %v991_v13 }
 0x168   : > { %v949_v16 = vpop.permute.xlu1 %948 }
 0x169   : > { %v933_v17 = vpop.permute.xlu0 %932  ;;  %984 = vst.msk [vmem:[#allocation2 + $0x68] sm:$0xff] %vm970_vm8, %v949_v16 }
 0x16a   : > { %976 = vst.msk [vmem:[#allocation2 + $0x28] sm:$0xff] %vm970_vm8, %v933_v17 }
 0x16c   : > { %v659_v18 = vpop.permute.xlu1 %658 }
 0x16d   : > { %v643_v19 = vpop.permute.xlu0 %642  ;;  %692 = vst.msk [vmem:[#allocation2 + $0x78] sm:$0xff] %vm676_vm5, %v659_v18 }
 0x16e   : > { %684 = vst.msk [vmem:[#allocation2 + $0x38] sm:$0xff] %vm676_vm5, %v643_v19 }
 0x170   : > { %v757_v14 = vpop.permute.xlu1 %756  ;;  %v1000_v4 = vld [vmem:[#allocation2 + $0x68] sm:$0xff] }
 0x171   : > { %v741_v22 = vpop.permute.xlu0 %740  ;;  %v992_v23 = vld [vmem:[#allocation2 + $0x28] sm:$0xff]  ;;  %791 = vst.msk [vmem:[#allocation2 + $0x70] sm:$0xff] %vm776_vm6, %v757_v14  ;;  %1514 = vmatmul.mubr.msk.f32.gmra.mrb[4].mxu1 %vm1012_vm9, %v1000_v4 }
 0x172   : > { %783 = vst.msk [vmem:[#allocation2 + $0x30] sm:$0xff] %vm776_vm6, %v741_v22  ;;  %1502 = vmatmul.mubr.msk.f32.gmra.mrb[4].mxu0 %vm1012_vm9, %v992_v23 }
 0x174   : > { %v759_v25 = vpop.permute.xlu1 %758 }
 0x175   : > { %v743_v27 = vpop.permute.xlu0 %742  ;;  %792 = vst.msk [vmem:[#allocation2 + $0x78] sm:$0xff] %vm776_vm6, %v759_v25 }
 0x176   : > { %784 = vst.msk [vmem:[#allocation2 + $0x38] sm:$0xff] %vm776_vm6, %v743_v27 }
 0x178   : > { %v854_v6 = vpop.permute.xlu1 %853 }
 0x179   : > { %v838_v29 = vpop.permute.xlu0 %837  ;;  %888 = vst.msk [vmem:[#allocation2 + $0x70] sm:$0xff] %vm873_vm7, %v854_v6 }
 0x17a   : > { %880 = vst.msk [vmem:[#allocation2 + $0x30] sm:$0xff] %vm873_vm7, %v838_v29 }
 0x17c   : > { %v856_v31 = vpop.permute.xlu1 %855 }
 0x17d   : > { %v840_v24 = vpop.permute.xlu0 %839  ;;  %889 = vst.msk [vmem:[#allocation2 + $0x78] sm:$0xff] %vm873_vm7, %v856_v31 }
 0x17e   : > { %881 = vst.msk [vmem:[#allocation2 + $0x38] sm:$0xff] %vm873_vm7, %v840_v24 }
 0x180   : > { %v951_v32 = vpop.permute.xlu1 %950 }
 0x181   : > { %v935_v33 = vpop.permute.xlu0 %934  ;;  %985 = vst.msk [vmem:[#allocation2 + $0x70] sm:$0xff] %vm970_vm8, %v951_v32 }
 0x182   : > { %977 = vst.msk [vmem:[#allocation2 + $0x30] sm:$0xff] %vm970_vm8, %v935_v33 }
 0x184   : > { %v953_v26 = vpop.permute.xlu1 %952 }
 0x185   : > { %v937_v34 = vpop.permute.xlu0 %936  ;;  %986 = vst.msk [vmem:[#allocation2 + $0x78] sm:$0xff] %vm970_vm8, %v953_v26 }
 0x186   : > { %978 = vst.msk [vmem:[#allocation2 + $0x38] sm:$0xff] %vm970_vm8, %v937_v34 }
 0x188   : > { %v1001_v28 = vld [vmem:[#allocation2 + $0x70] sm:$0xff] }
 0x189   : > { %v993_v35 = vld [vmem:[#allocation2 + $0x30] sm:$0xff]  ;;  %1516 = vmatprep.mubr.msk.f32.mxu1 %vm1012_vm9, %v1001_v28 }
 0x18a   : > { %1504 = vmatprep.mubr.msk.f32.mxu0 %vm1012_vm9, %v993_v35 }
 0x18c   : > { %v1002_v37 = vld [vmem:[#allocation2 + $0x78] sm:$0xff] }
 0x18d   : > { %v994_v36 = vld [vmem:[#allocation2 + $0x38] sm:$0xff]  ;;  %1517 = vmatmul.mubr.msk.f32.gmra.mrb[6].mxu1 %vm1012_vm9, %v1002_v37 }
 0x18e   : > { %1505 = vmatmul.mubr.msk.f32.gmra.mrb[6].mxu0 %vm1012_vm9, %v994_v36 }
 0x1c8   : > { %v1497_v38 = vpop.f32.mrb[0].mxu0 }
 0x1c9   : > { %v1509_v30 = vpop.f32.mrb[0].mxu1  ;;  %1207 = vst.msk [vmem:[%s2178_s28 + $0x8] sm:$0xff] %vm188_vm0, %v1497_v38  ;;  %v1127_v39 = vpop.f32.mrb[1].mxu0 }
 0x1ca   : > { %1215 = vst.msk [vmem:[%s2178_s28 + $0x48] sm:$0xff] %vm188_vm0, %v1509_v30  ;;  %v1167_v40 = vpop.f32.mrb[1].mxu1  ;;  %1206 = vst.msk [vmem:[%s2178_s28] sm:$0xff] %vm188_vm0, %v1127_v39 }
 0x1cb   : > { %1214 = vst.msk [vmem:[%s2178_s28 + $0x40] sm:$0xff] %vm188_vm0, %v1167_v40 }
 0x208   : > { %v1500_v41 = vpop.f32.mrb[2].mxu0 }
 0x209   : > { %v1512_v42 = vpop.f32.mrb[2].mxu1  ;;  %1209 = vst.msk [vmem:[%s2178_s28 + $0x18] sm:$0xff] %vm188_vm0, %v1500_v41  ;;  %v1137_v43 = vpop.f32.mrb[3].mxu0 }
 0x20a   : > { %1217 = vst.msk [vmem:[%s2178_s28 + $0x58] sm:$0xff] %vm188_vm0, %v1512_v42  ;;  %v1177_v44 = vpop.f32.mrb[3].mxu1  ;;  %1208 = vst.msk [vmem:[%s2178_s28 + $0x10] sm:$0xff] %vm188_vm0, %v1137_v43 }
 0x20b   : > { %1216 = vst.msk [vmem:[%s2178_s28 + $0x50] sm:$0xff] %vm188_vm0, %v1177_v44 }
 0x244   : > { %v1515_v46 = vpop.f32.mrb[4].mxu1 }
 0x245   : > { %v1503_v45 = vpop.f32.mrb[4].mxu0  ;;  %1219 = vst.msk [vmem:[%s2178_s28 + $0x68] sm:$0xff] %vm188_vm0, %v1515_v46  ;;  %v1187_v48 = vpop.f32.mrb[5].mxu1 }
 0x246   : > { %1211 = vst.msk [vmem:[%s2178_s28 + $0x28] sm:$0xff] %vm188_vm0, %v1503_v45  ;;  %v1147_v47 = vpop.f32.mrb[5].mxu0  ;;  %1218 = vst.msk [vmem:[%s2178_s28 + $0x60] sm:$0xff] %vm188_vm0, %v1187_v48 }
 0x247   : > { %1210 = vst.msk [vmem:[%s2178_s28 + $0x20] sm:$0xff] %vm188_vm0, %v1147_v47 }
 0x260   : > { %v1518_v50 = vpop.f32.mrb[6].mxu1 }
 0x261   : > { %v1506_v49 = vpop.f32.mrb[6].mxu0  ;;  %1221 = vst.msk [vmem:[%s2178_s28 + $0x78] sm:$0xff] %vm188_vm0, %v1518_v50  ;;  %v1197_v52 = vpop.f32.mrb[7].mxu1 }
 0x262   : > { %1213 = vst.msk [vmem:[%s2178_s28 + $0x38] sm:$0xff] %vm188_vm0, %v1506_v49  ;;  %v1157_v51 = vpop.f32.mrb[7].mxu0  ;;  %1220 = vst.msk [vmem:[%s2178_s28 + $0x70] sm:$0xff] %vm188_vm0, %v1197_v52 }
 0x263   : > { %1212 = vst.msk [vmem:[%s2178_s28 + $0x30] sm:$0xff] %vm188_vm0, %v1157_v51 }
 0x264 PF: > { %s12_s13 = sadd.s32 1, %s1632_s13   ;;  %s2230_s9 = smov %s1624_s11 }
 0x265   : > { %p9_p7 = scmp.ge.s32.totalorder %s12_s13, 6   ;;  %s2231_s10 = smov %s1628_s12 }
 0x266   : > { %s2232_s11 = smov %s2235_s14  ;;  %s2233_s12 = smov %s2239_s15 }
 0x267   :  { %11 = sbr.rel (!%p9_p7) target bundleno = 3 (0x3), region = 61 }

</bundles_post_ra>
